<compile_context>
chip_gen: v7x
topology: tpu7x:2x2x1
jax: 0.10.0
libtpu: 0.0.40
codegen_flags: <defaults>
</compile_context>

<pallas_src>
import functools
import math

import jax
import jax.numpy as jnp
from jax.experimental import pallas as pl
from jax.experimental.pallas import tpu as pltpu


# --------------------------------- kernel ------------------------------------

def fmha_kernel(x_ref, wqkv_ref, bqkv_ref, wd_ref, bd_ref, out_ref, *, num_heads):
    seq_len, hidden = x_ref.shape
    head_dim = hidden // num_heads
    mxu_dtype = wqkv_ref.dtype          # matmul-operand dtype (f32, or bf16 on v6e/v7x)

    x = x_ref[...].astype(mxu_dtype)                                    # (L, H)

    # Fused QKV projection: ONE (L,H)@(H,3H) matmul; 1/sqrt(dh) already folded
    # into the query columns / bias on the host. f32 accumulation + f32 bias.
    qkv = jnp.dot(x, wqkv_ref[...],
                  preferred_element_type=jnp.float32) + bqkv_ref[...]    # (L, 3H) f32

    def split_heads(t):  # (L, H) -> (heads, L, dh); static lane slices + major-dim stack
        return jnp.stack(
            [t[:, h * head_dim:(h + 1) * head_dim] for h in range(num_heads)],
            axis=0)

    q = split_heads(qkv[:, :hidden]).astype(mxu_dtype)
    k = split_heads(qkv[:, hidden:2 * hidden]).astype(mxu_dtype)
    v = split_heads(qkv[:, 2 * hidden:]).astype(mxu_dtype)               # (h, L, dh)

    # Scores for all heads at once (batched dot_general), numerically stable
    # softmax entirely in f32.  Reciprocal goes to the EUP slot.
    s = jnp.einsum('hqd,hkd->hqk', q, k, preferred_element_type=jnp.float32)
    s = s - jnp.max(s, axis=-1, keepdims=True)
    p = jnp.exp(s)
    p = p * pl.reciprocal(jnp.sum(p, axis=-1, keepdims=True), approx=True)
    # attn_dropout: identity at inference; `mask` is unused by the reference forward.

    # SFusion: ctx = scores @ value per head.
    ctx = jnp.einsum('hqk,hkd->hqd', p.astype(mxu_dtype), v,
                     preferred_element_type=jnp.float32)                 # (h, L, dh) f32

    # Merge heads along the lane dim, then ONE (L,H)@(H,H) dense matmul
    # (contraction depth H; no (h,L,H) partials tensor, no h-1 VPU adds).
    merged = jnp.concatenate([ctx[h] for h in range(num_heads)],
                             axis=-1).astype(mxu_dtype)                  # (L, H)
    out_ref[...] = jnp.dot(merged, wd_ref[...],
                           preferred_element_type=jnp.float32) + bd_ref[...]


# --------------------------------- wrapper -----------------------------------

def fmha_forward(x, params, num_heads, *, mxu_dtype=jnp.float32):
    """x: (B, L, H) float32.  params follow the torch nn.Linear convention:
    W: (out, in), b: (out,) for query/key/value/dense.  Returns (B, L, H) f32.

    mxu_dtype: dtype of matmul *operands* (accumulation and all softmax / bias
    math stay f32).  Use jnp.bfloat16 on v6e / v7x for native MXU rate and
    half the weight DMA/residency; keep jnp.float32 if bit-tight accuracy is
    required."""
    B, L, H = x.shape
    assert H % num_heads == 0
    dh = H // num_heads
    wq, bq, wk, bk, wv, bv, wd, bd = params

    # ---- host-side (trace-time) weight prep -------------------------------
    # Fold the 1/sqrt(dh) attention scale into the query projection, transpose
    # to (in, out), and concatenate q/k/v into one weight so the kernel runs a
    # single fused QKV matmul.  Dense weight is just transposed.
    scale = 1.0 / math.sqrt(dh)
    w_qkv = jnp.concatenate([wq.T * scale, wk.T, wv.T], axis=1).astype(mxu_dtype)  # (H, 3H)
    b_qkv = jnp.concatenate([bq * scale, bk, bv]).reshape(1, 3 * H).astype(jnp.float32)
    wd_t = wd.T.astype(mxu_dtype)                                                   # (H, H)
    bd_r = bd.reshape(1, H).astype(jnp.float32)

    # batch dim squeezed -> kernel refs are clean 2-D (sublane, lane) tiles.
    act_spec = pl.BlockSpec((None, L, H), lambda b: (b, 0, 0))
    # Constant index maps: weights/biases DMA'd once, resident across the grid.
    w_qkv_spec = pl.BlockSpec((H, 3 * H), lambda b: (0, 0))
    b_qkv_spec = pl.BlockSpec((1, 3 * H), lambda b: (0, 0))
    wd_spec = pl.BlockSpec((H, H), lambda b: (0, 0))
    bd_spec = pl.BlockSpec((1, H), lambda b: (0, 0))

    w_itemsize = jnp.dtype(mxu_dtype).itemsize
    cost = pl.CostEstimate(
        flops=int(B * (8 * L * H * H + 4 * num_heads * L * L * dh)),
        transcendentals=int(B * num_heads * L * L),
        bytes_accessed=int(2 * B * L * H * 4                    # x in + out
                           + (3 * H * H + H * H) * w_itemsize   # weights
                           + 4 * H * 4),                        # biases
    )

    kernel = functools.partial(fmha_kernel, num_heads=num_heads)
    return pl.pallas_call(
        kernel,
        out_shape=jax.ShapeDtypeStruct((B, L, H), jnp.float32),
        grid_spec=pltpu.PrefetchScalarGridSpec(
            num_scalar_prefetch=0,
            grid=(B,),
            in_specs=[act_spec, w_qkv_spec, b_qkv_spec, wd_spec, bd_spec],
            out_specs=act_spec,
        ),
        compiler_params=pltpu.CompilerParams(
            dimension_semantics=("parallel",),
            vmem_limit_bytes=32 * 1024 * 1024,   # explicit, safe on v7x (64 MiB/TC)
        ),
        cost_estimate=cost,
    )(x, w_qkv, b_qkv, wd_t, bd_r)


# --------------------------- pure-JAX reference -------------------------------

def fmha_reference(x, params, num_heads):
    wq, bq, wk, bk, wv, bv, wd, bd = params
    B, L, H = x.shape
    dh = H // num_heads

    q = x @ wq.T + bq
    k = x @ wk.T + bk
    v = x @ wv.T + bv

    def split(t):
        return t.reshape(B, L, num_heads, dh).transpose(0, 2, 1, 3)

    qh, kh, vh = split(q), split(k), split(v)
    att = jnp.einsum('bhqd,bhkd->bhqk', qh, kh) / math.sqrt(dh)
    sc = jax.nn.softmax(att, axis=-1)
    ctx = jnp.einsum('bhqk,bhkd->bhqd', sc, vh)
    merged = ctx.transpose(0, 2, 1, 3).reshape(B, L, H)   # SFusion merge
    return merged @ wd.T + bd


# ----------------------------------- main -------------------------------------

if __name__ == "__main__":
    B, L, hidden = 2, 8, 32
    num_heads = 4                     # n_heads_fusion; hidden % num_heads == 0

    key = jax.random.PRNGKey(0)
    keys = jax.random.split(key, 9)
    kx, kw = keys[0], keys[1:]

    x = jax.random.normal(kx, (B, L, hidden), jnp.float32)

    def W(k):
        return jax.random.normal(k, (hidden, hidden), jnp.float32) * 0.05

    def Bv(k):
        return jax.random.normal(k, (hidden,), jnp.float32) * 0.02

    params = (
        W(kw[0]), Bv(kw[1]),   # query
        W(kw[2]), Bv(kw[3]),   # key
        W(kw[4]), Bv(kw[5]),   # value
        W(kw[6]), Bv(kw[7]),   # dense
    )

    ref = fmha_reference(x, params, num_heads)

    # f32 MXU operands (default): tight tolerance (approx-reciprocal only).
    out_f32 = jax.block_until_ready(fmha_forward(x, params, num_heads))
    assert out_f32.shape == (B, L, hidden)
    err_f32 = float(jnp.max(jnp.abs(out_f32 - ref)))
    assert err_f32 < 1e-3, f"f32 kernel mismatch vs reference: {err_f32}"

    # bf16 MXU operands (v6e/v7x recommendation): looser tolerance.
    out_bf16 = jax.block_until_ready(
        fmha_forward(x, params, num_heads, mxu_dtype=jnp.bfloat16))
    err_bf16 = float(jnp.max(jnp.abs(out_bf16 - ref)))
    assert err_bf16 < 2e-2, f"bf16 kernel mismatch vs reference: {err_bf16}"

    print("KERNEL_OK")
</pallas_src>

<mosaic_0001>
module attributes {stable_mosaic.version = 11 : i64} {
  func.func @fmha_kernel(%arg0: i32, %arg1: memref<1x8x32xf32, #tpu.memory_space<vmem>>, %arg2: memref<32x96xf32, #tpu.memory_space<vmem>>, %arg3: memref<1x96xf32, #tpu.memory_space<vmem>>, %arg4: memref<32x32xf32, #tpu.memory_space<vmem>>, %arg5: memref<1x32xf32, #tpu.memory_space<vmem>>, %arg6: memref<1x8x32xf32, #tpu.memory_space<vmem>>) attributes {dimension_semantics = [#tpu.dimension_semantics<parallel>], iteration_bounds = array<i64: 2>, scalar_prefetch = 0 : i64, scratch_operands = 0 : i64, tpu.core_type = #tpu.core_type<tc>, window_params = [{transform_indices = @transform_0, window_bounds = array<i64: 1, 8, 32>}, {pipeline_mode = #tpu.pipeline_mode<synchronous>, transform_indices = @transform_1, window_bounds = array<i64: 32, 96>}, {pipeline_mode = #tpu.pipeline_mode<synchronous>, transform_indices = @transform_2, window_bounds = array<i64: 1, 96>}, {pipeline_mode = #tpu.pipeline_mode<synchronous>, transform_indices = @transform_3, window_bounds = array<i64: 32, 32>}, {pipeline_mode = #tpu.pipeline_mode<synchronous>, transform_indices = @transform_4, window_bounds = array<i64: 1, 32>}, {transform_indices = @transform_5, window_bounds = array<i64: 1, 8, 32>}]} {
    %c0 = arith.constant 0 : index
    %c0_0 = arith.constant 0 : index
    %c0_1 = arith.constant 0 : index
    %0 = vector.load %arg1[%c0, %c0_0, %c0_1] : memref<1x8x32xf32, #tpu.memory_space<vmem>>, vector<1x8x32xf32>
    %1 = vector.shape_cast %0 : vector<1x8x32xf32> to vector<8x32xf32>
    %c0_2 = arith.constant 0 : index
    %c0_3 = arith.constant 0 : index
    %2 = vector.load %arg2[%c0_2, %c0_3] : memref<32x96xf32, #tpu.memory_space<vmem>>, vector<32x96xf32>
    %cst = arith.constant dense<0.000000e+00> : vector<8x96xf32>
    %3 = tpu.matmul %1, %2, %cst {dimension_numbers = #tpu.dot_dimension_numbers<[1], [0], [0], [1], [0, 0, 1, 1], [], []>} : vector<8x32xf32>, vector<32x96xf32>, vector<8x96xf32> -> vector<8x96xf32>
    %c0_4 = arith.constant 0 : index
    %c0_5 = arith.constant 0 : index
    %4 = vector.load %arg3[%c0_4, %c0_5] : memref<1x96xf32, #tpu.memory_space<vmem>>, vector<1x96xf32>
    %5 = vector.broadcast %4 : vector<1x96xf32> to vector<8x96xf32>
    %6 = arith.addf %3, %5 : vector<8x96xf32>
    %7 = vector.extract_strided_slice %6 {offsets = [0, 0], sizes = [8, 32], strides = [1, 1]} : vector<8x96xf32> to vector<8x32xf32>
    %8 = vector.extract_strided_slice %7 {offsets = [0, 0], sizes = [8, 8], strides = [1, 1]} : vector<8x32xf32> to vector<8x8xf32>
    %9 = vector.extract_strided_slice %7 {offsets = [0, 8], sizes = [8, 8], strides = [1, 1]} : vector<8x32xf32> to vector<8x8xf32>
    %10 = vector.extract_strided_slice %7 {offsets = [0, 16], sizes = [8, 8], strides = [1, 1]} : vector<8x32xf32> to vector<8x8xf32>
    %11 = vector.extract_strided_slice %7 {offsets = [0, 24], sizes = [8, 8], strides = [1, 1]} : vector<8x32xf32> to vector<8x8xf32>
    %12 = vector.shape_cast %8 : vector<8x8xf32> to vector<1x8x8xf32>
    %13 = vector.shape_cast %9 : vector<8x8xf32> to vector<1x8x8xf32>
    %14 = vector.shape_cast %10 : vector<8x8xf32> to vector<1x8x8xf32>
    %15 = vector.shape_cast %11 : vector<8x8xf32> to vector<1x8x8xf32>
    %16 = tpu.concatenate %12, %13, %14, %15 in 0 : vector<1x8x8xf32>, vector<1x8x8xf32>, vector<1x8x8xf32>, vector<1x8x8xf32> -> vector<4x8x8xf32>
    %17 = vector.extract_strided_slice %6 {offsets = [0, 32], sizes = [8, 32], strides = [1, 1]} : vector<8x96xf32> to vector<8x32xf32>
    %18 = vector.extract_strided_slice %17 {offsets = [0, 0], sizes = [8, 8], strides = [1, 1]} : vector<8x32xf32> to vector<8x8xf32>
    %19 = vector.extract_strided_slice %17 {offsets = [0, 8], sizes = [8, 8], strides = [1, 1]} : vector<8x32xf32> to vector<8x8xf32>
    %20 = vector.extract_strided_slice %17 {offsets = [0, 16], sizes = [8, 8], strides = [1, 1]} : vector<8x32xf32> to vector<8x8xf32>
    %21 = vector.extract_strided_slice %17 {offsets = [0, 24], sizes = [8, 8], strides = [1, 1]} : vector<8x32xf32> to vector<8x8xf32>
    %22 = vector.shape_cast %18 : vector<8x8xf32> to vector<1x8x8xf32>
    %23 = vector.shape_cast %19 : vector<8x8xf32> to vector<1x8x8xf32>
    %24 = vector.shape_cast %20 : vector<8x8xf32> to vector<1x8x8xf32>
    %25 = vector.shape_cast %21 : vector<8x8xf32> to vector<1x8x8xf32>
    %26 = tpu.concatenate %22, %23, %24, %25 in 0 : vector<1x8x8xf32>, vector<1x8x8xf32>, vector<1x8x8xf32>, vector<1x8x8xf32> -> vector<4x8x8xf32>
    %27 = vector.extract_strided_slice %6 {offsets = [0, 64], sizes = [8, 32], strides = [1, 1]} : vector<8x96xf32> to vector<8x32xf32>
    %28 = vector.extract_strided_slice %27 {offsets = [0, 0], sizes = [8, 8], strides = [1, 1]} : vector<8x32xf32> to vector<8x8xf32>
    %29 = vector.extract_strided_slice %27 {offsets = [0, 8], sizes = [8, 8], strides = [1, 1]} : vector<8x32xf32> to vector<8x8xf32>
    %30 = vector.extract_strided_slice %27 {offsets = [0, 16], sizes = [8, 8], strides = [1, 1]} : vector<8x32xf32> to vector<8x8xf32>
    %31 = vector.extract_strided_slice %27 {offsets = [0, 24], sizes = [8, 8], strides = [1, 1]} : vector<8x32xf32> to vector<8x8xf32>
    %32 = vector.shape_cast %28 : vector<8x8xf32> to vector<1x8x8xf32>
    %33 = vector.shape_cast %29 : vector<8x8xf32> to vector<1x8x8xf32>
    %34 = vector.shape_cast %30 : vector<8x8xf32> to vector<1x8x8xf32>
    %35 = vector.shape_cast %31 : vector<8x8xf32> to vector<1x8x8xf32>
    %36 = tpu.concatenate %32, %33, %34, %35 in 0 : vector<1x8x8xf32>, vector<1x8x8xf32>, vector<1x8x8xf32>, vector<1x8x8xf32> -> vector<4x8x8xf32>
    "tpu.trace_start"() <{level = 10 : i32, message = "hqd,hkd->hqk"}> : () -> ()
    %cst_6 = arith.constant dense<0.000000e+00> : vector<4x8x8xf32>
    %37 = tpu.matmul %16, %26, %cst_6 {dimension_numbers = #tpu.dot_dimension_numbers<[2], [2], [1], [1], [0, 0, 0, 1, 1, 1], [0], [0]>} : vector<4x8x8xf32>, vector<4x8x8xf32>, vector<4x8x8xf32> -> vector<4x8x8xf32>
    "tpu.trace_stop"() : () -> ()
    %cst_7 = arith.constant dense<0xFF800000> : vector<4x8xf32>
    %38 = vector.multi_reduction <maximumf>, %37, %cst_7 [2] : vector<4x8x8xf32> to vector<4x8xf32>
    %39 = vector.shape_cast %38 : vector<4x8xf32> to vector<4x8x1xf32>
    %40 = vector.broadcast %39 : vector<4x8x1xf32> to vector<4x8x8xf32>
    %41 = arith.subf %37, %40 : vector<4x8x8xf32>
    %42 = math.exp %41 : vector<4x8x8xf32>
    %cst_8 = arith.constant dense<0.000000e+00> : vector<4x8xf32>
    %43 = vector.multi_reduction <add>, %42, %cst_8 [2] : vector<4x8x8xf32> to vector<4x8xf32>
    %44 = vector.shape_cast %43 : vector<4x8xf32> to vector<4x8x1xf32>
    %45 = tpu.reciprocal %44 {approx = true} : vector<4x8x1xf32> -> vector<4x8x1xf32>
    %46 = vector.broadcast %45 : vector<4x8x1xf32> to vector<4x8x8xf32>
    %47 = arith.mulf %42, %46 : vector<4x8x8xf32>
    "tpu.trace_start"() <{level = 10 : i32, message = "hqk,hkd->hqd"}> : () -> ()
    %cst_9 = arith.constant dense<0.000000e+00> : vector<4x8x8xf32>
    %48 = tpu.matmul %47, %36, %cst_9 {dimension_numbers = #tpu.dot_dimension_numbers<[2], [1], [1], [2], [0, 0, 0, 1, 1, 2], [0], [0]>} : vector<4x8x8xf32>, vector<4x8x8xf32>, vector<4x8x8xf32> -> vector<4x8x8xf32>
    "tpu.trace_stop"() : () -> ()
    %49 = vector.extract_strided_slice %48 {offsets = [0, 0, 0], sizes = [1, 8, 8], strides = [1, 1, 1]} : vector<4x8x8xf32> to vector<1x8x8xf32>
    %50 = vector.shape_cast %49 : vector<1x8x8xf32> to vector<8x8xf32>
    %51 = vector.extract_strided_slice %48 {offsets = [1, 0, 0], sizes = [1, 8, 8], strides = [1, 1, 1]} : vector<4x8x8xf32> to vector<1x8x8xf32>
    %52 = vector.shape_cast %51 : vector<1x8x8xf32> to vector<8x8xf32>
    %53 = vector.extract_strided_slice %48 {offsets = [2, 0, 0], sizes = [1, 8, 8], strides = [1, 1, 1]} : vector<4x8x8xf32> to vector<1x8x8xf32>
    %54 = vector.shape_cast %53 : vector<1x8x8xf32> to vector<8x8xf32>
    %55 = vector.extract_strided_slice %48 {offsets = [3, 0, 0], sizes = [1, 8, 8], strides = [1, 1, 1]} : vector<4x8x8xf32> to vector<1x8x8xf32>
    %56 = vector.shape_cast %55 : vector<1x8x8xf32> to vector<8x8xf32>
    %57 = tpu.concatenate %50, %52, %54, %56 in 1 : vector<8x8xf32>, vector<8x8xf32>, vector<8x8xf32>, vector<8x8xf32> -> vector<8x32xf32>
    %c0_10 = arith.constant 0 : index
    %c0_11 = arith.constant 0 : index
    %58 = vector.load %arg4[%c0_10, %c0_11] : memref<32x32xf32, #tpu.memory_space<vmem>>, vector<32x32xf32>
    %cst_12 = arith.constant dense<0.000000e+00> : vector<8x32xf32>
    %59 = tpu.matmul %57, %58, %cst_12 {dimension_numbers = #tpu.dot_dimension_numbers<[1], [0], [0], [1], [0, 0, 1, 1], [], []>} : vector<8x32xf32>, vector<32x32xf32>, vector<8x32xf32> -> vector<8x32xf32>
    %c0_13 = arith.constant 0 : index
    %c0_14 = arith.constant 0 : index
    %60 = vector.load %arg5[%c0_13, %c0_14] : memref<1x32xf32, #tpu.memory_space<vmem>>, vector<1x32xf32>
    %61 = vector.broadcast %60 : vector<1x32xf32> to vector<8x32xf32>
    %62 = arith.addf %59, %61 : vector<8x32xf32>
    %c0_15 = arith.constant 0 : index
    %c0_16 = arith.constant 0 : index
    %c0_17 = arith.constant 0 : index
    %63 = vector.load %arg6[%c0_15, %c0_16, %c0_17] : memref<1x8x32xf32, #tpu.memory_space<vmem>>, vector<1x8x32xf32>
    %64 = vector.shape_cast %63 : vector<1x8x32xf32> to vector<8x32xf32>
    %65 = vector.shape_cast %62 : vector<8x32xf32> to vector<1x8x32xf32>
    tpu.vector_store %arg6[%c0_15, %c0_16, %c0_17], %65 {strides = array<i32>} : memref<1x8x32xf32, #tpu.memory_space<vmem>>, vector<1x8x32xf32>,
    return
  }
  func.func @transform_0(%arg0: i32) -> (i32, i32, i32) {
    %c0_i32 = arith.constant 0 : i32
    %c0_i32_0 = arith.constant 0 : i32
    %c0_i32_1 = arith.constant 0 : i32
    return %arg0, %c0_i32, %c0_i32_0 : i32, i32, i32
  }
  func.func @transform_1(%arg0: i32) -> (i32, i32) {
    %c0_i32 = arith.constant 0 : i32
    %c0_i32_0 = arith.constant 0 : i32
    %c0_i32_1 = arith.constant 0 : i32
    return %c0_i32, %c0_i32_0 : i32, i32
  }
  func.func @transform_2(%arg0: i32) -> (i32, i32) {
    %c0_i32 = arith.constant 0 : i32
    %c0_i32_0 = arith.constant 0 : i32
    %c0_i32_1 = arith.constant 0 : i32
    return %c0_i32, %c0_i32_0 : i32, i32
  }
  func.func @transform_3(%arg0: i32) -> (i32, i32) {
    %c0_i32 = arith.constant 0 : i32
    %c0_i32_0 = arith.constant 0 : i32
    %c0_i32_1 = arith.constant 0 : i32
    return %c0_i32, %c0_i32_0 : i32, i32
  }
  func.func @transform_4(%arg0: i32) -> (i32, i32) {
    %c0_i32 = arith.constant 0 : i32
    %c0_i32_0 = arith.constant 0 : i32
    %c0_i32_1 = arith.constant 0 : i32
    return %c0_i32, %c0_i32_0 : i32, i32
  }
  func.func @transform_5(%arg0: i32) -> (i32, i32, i32) {
    %c0_i32 = arith.constant 0 : i32
    %c0_i32_0 = arith.constant 0 : i32
    %c0_i32_1 = arith.constant 0 : i32
    return %arg0, %c0_i32, %c0_i32_0 : i32, i32, i32
  }
}

</mosaic_0001>

<bundles_post_ra>
// kernel: tpu_custom_call.1
= control target key start
LH: loop header
LB: loop body
LE: loop exit
PB: predicated region body
PF: predicated region fallthrough
CT: control target
= control target key end

     0   :  { %10 = vsyncpa [#allocation3], 0  ;;  %s1962_s0 = inlined_call_operand.hbm [shape: f32[2,8,32], index: 0, kind: input, shape index: {}]   ;;  %s1963_s1 = inlined_call_operand.hbm [shape: f32[32,96], index: 1, kind: input, shape index: {}]   ;;  %s1964_s2 = inlined_call_operand.vmem [shape: f32[1,96], index: 2, kind: input, shape index: {}]   ;;  %s1965_s3 = inlined_call_operand.hbm [shape: f32[32,32], index: 3, kind: input, shape index: {}]   ;;  %s1966_s4 = inlined_call_operand.vmem [shape: f32[1,32], index: 4, kind: input, shape index: {}]   ;;  %s1967_s5 = inlined_call_operand.hbm [shape: f32[2,8,32], index: 5, kind: output, shape index: {}]  }
   0x1   :  { %12 = vsyncpa [#allocation3 + $0x1], 0 }
   0x2   :  { %13 = vsyncpa [#allocation6], 0 }
   0x3   :  { %14 = vsyncpa [#allocation4], 0 }
   0x4   :  { %16 = vsyncpa [#allocation4 + $0x1], 0  ;;  %s1653_s18 = smov 0   ;;  %s1655_s19 = smov 0  }
   0x5   :  { %s1657_s20 = smov 0   ;;  %s1659_s21 = smov 0  }
   0x6 LB: > { %s1674_s22 = sadd.s32 4294967295, %s1604_s21   ;;  %s1220_s23 = sadd.s32 4294967294, %s1604_s21   ;;  %s1604_s21 = sphi %s1659_s21, %s1987_s21   ;;  %s1600_s20 = sphi %s1657_s20, %s1986_s20   ;;  %s1596_s19 = sphi %s1655_s19, %s1985_s19   ;;  %s1592_s18 = sphi %s1653_s18, %s1984_s18  }
   0x7   : > { %p42_p0 = scmp.ne.s32.totalorder %s1596_s19, %s1592_s18  ;;  %p1968_p1 = scmp.eq.s32.totalorder %s1674_s22, 0 }
   0x8   : > { %p156_p3 = scmp.eq.s32.totalorder %s1220_s23, 1  ;;  %p1221_p5 = scmp.ge.s32.totalorder %s1604_s21, 1 }
   0x9   : > { %p1683_p4 = por %p1968_p1, %p42_p0  ;;  %p163_p7 = scmp.lt.s32.totalorder %s1604_s21, 3 }
   0xa   : > { %p1688_p6 = por %p156_p3, %p42_p0  ;;  %s1606_s27 = smov [#allocation5]  }
   0xb   : > { %s1971_s24 = scalar_select %p1683_p4, 1, 0 }
   0xc   : > { %s1972_s25 = scalar_select %p1688_p6, 1, 0 }
   0xd   : > { %p1693_p8 = pnand %p1221_p5, %p163_p7  ;;  %s175_s28 = sshll.u32 %s1606_s27, 4  ;;  %s1697_s28 = int_to_ptr.vmem [resolvable:$true] %s175_s28 }
   0xe   : > { %s1607_s30 = smov [#allocation7]   ;;  %s1448_s9 = scalar_lea.hbm %s1963_s1, 512 }
   0xf   : > { %p1364_p9 = pneg %p1693_p8  ;;  %s191_s6 = sshll.u32 %s1607_s30, 4  ;;  %s1708_s6 = int_to_ptr.vmem [resolvable:$true] %s191_s6 }
  0x10   : > { %p1449_p12 = scmp.ne.s32.totalorder %s1963_s1, %s1448_s9  ;;  %p1455_p5 = scmp.lt.u32.totalorder %s1448_s9, %s1963_s1 }
  0x11   : > { %p1704_p11 = pnand %p1364_p9, %p1968_p1 }
  0x13   : > { %p1450_p13 = pneg %p1704_p11 }
  0x15   : > { %p1451_p0 = pnand %p1450_p13, %p1449_p12 }
  0x17   : > { %p1452_p3 = pneg %p1451_p0 }
  0x19   : > { %p1457_p7 = pnand %p1455_p5, %p1452_p3 }
  0x1b   : > { %1460 = shalt.err (!%p1457_p7)
}
  0x1c   : > { %s1461_s14 = scalar_lea.vmem %s1697_s28, 512  ;;  %p1469_p2 = scmp.lt.s32.totalorder %s1697_s28, %s1697_s28 }
  0x1d   : > { %p1462_p9 = scmp.ne.s32.totalorder %s1697_s28, %s1461_s14  ;;  %p1470_p12 = scmp.lt.s32.totalorder %s1461_s14, %s1461_s14 }
  0x1f   : > { %p1464_p10 = pnand %p1462_p9, %p1450_p13  ;;  %p1471_p0 = por %p1470_p12, %p1469_p2 }
  0x21   : > { %p1465_p1 = pneg %p1464_p10 }
  0x23   : > { %p1472_p6 = pnand %p1471_p0, %p1465_p1 }
  0x25   : > { %1475 = shalt.err (!%p1472_p6)
}
  0x26   : > { %s1608_s15 = smov 128   ;;  %s1609_s16 = smov 8  }
  0x27   : > { %1367 = dma.hbm_to_vmem [thread:$0]  (!%p1704_p11), %s1963_s1, 512, %s1697_s28, [#allocation6], %s1608_s15, %s1608_s15, %s1609_s16  }
  0x28   : > { %s1476_s7 = scalar_lea.hbm %s1965_s3, 512 }
  0x29   : > { %p1477_p2 = scmp.ne.s32.totalorder %s1965_s3, %s1476_s7  ;;  %p1483_p10 = scmp.lt.u32.totalorder %s1476_s7, %s1965_s3 }
  0x2b   : > { %p1479_p1 = pnand %p1477_p2, %p1450_p13 }
  0x2d   : > { %p1480_p6 = pneg %p1479_p1 }
  0x2f   : > { %p1485_p3 = pnand %p1483_p10, %p1480_p6 }
  0x31   : > { %1488 = shalt.err (!%p1485_p3)
}
  0x32   : > { %s1489_s28 = scalar_lea.vmem %s1708_s6, 512  ;;  %p1497_p12 = scmp.lt.s32.totalorder %s1708_s6, %s1708_s6 }
  0x33   : > { %p1490_p5 = scmp.ne.s32.totalorder %s1708_s6, %s1489_s28  ;;  %p1498_p0 = scmp.lt.s32.totalorder %s1489_s28, %s1489_s28 }
  0x35   : > { %p1492_p7 = pnand %p1490_p5, %p1450_p13  ;;  %p1499_p2 = por %p1498_p0, %p1497_p12 }
  0x37   : > { %p1493_p9 = pneg %p1492_p7 }
  0x39   : > { %p1500_p1 = pnand %p1499_p2, %p1493_p9 }
  0x3b   : > { %1503 = shalt.err (!%p1500_p1)
}
  0x3c   : > { %1370 = dma.hbm_to_vmem [thread:$0]  (!%p1704_p11), %s1965_s3, 512, %s1708_s6, [#allocation6], %s1608_s15, %s1608_s15, %s1609_s16  }
  0x3d   : > { %s1763_s14 = sadd.s32 1, %s1604_s21   ;;  %s29_s29 = sadd.s32 1, %s1600_s20 }
  0x3e   : > { %s26_s17 = ssub.s32 %s1604_s21, %s1763_s14  ;;  %p36_p13 = scmp.ne.s32.totalorder %s1600_s20, %s1596_s19 }
  0x3f   : > { %p27_p6 = scmp.eq.s32.totalorder %s26_s17, 0  ;;  %p37_p10 = scmp.eq.s32.totalorder %s1604_s21, 0 }
  0x40   : > { %p1975_p3 = scmp.eq.s32.totalorder %s1674_s22, 1  ;;  %p1381_p7 = scmp.lt.s32.totalorder %s1604_s21, 2 }
  0x41   : > { %s1779_s27 = scalar_select %p27_p6, %s1600_s20, %s29_s29  }
  0x42   : > { %p1773_p5 = por %p1975_p3, %p36_p13  ;;  %p38_p9 = por %p37_p10, %p36_p13 }
  0x43   : > { %s208_s30 = sand.u32 1, %s1600_s20   ;;  %s1226_s6 = sshll.u32 %s1604_s21, 7 }
  0x44   : > { %s1976_s23 = scalar_select %p1773_p5, 1, 0 }
  0x45   : > { %s1225_s7 = sshll.u32 %s208_s30, 3  ;;  %s1786_s8 = scalar_lea.hbm %s1962_s0, %s1226_s6 }
  0x46   : > { %s212_s9 = scalar_lea.vmem [#allocation2], %s1225_s7  ;;  %p1790_p11 = pnand %p1381_p7, %p38_p9 }
  0x47   : > { %s219_s10 = sshll.u32 %s212_s9, 4  ;;  %s209_s28 = scalar_lea.sflag [#allocation3], %s208_s30  ;;  %s1788_s10 = int_to_ptr.vmem [resolvable:$true] %s219_s10 }
  0x48   : > { %s1504_s12 = scalar_lea.hbm %s1786_s8, 128  ;;  %p1506_p0 = pneg %p1790_p11 }
  0x49   : > { %p1505_p12 = scmp.ne.s32.totalorder %s1786_s8, %s1504_s12  ;;  %s1509_s17 = scalar_lea.hbm %s1962_s0, 256 }
  0x4a   : > { %p1510_p13 = scmp.lt.u32.totalorder %s1786_s8, %s1962_s0  ;;  %p1511_p6 = scmp.lt.u32.totalorder %s1509_s17, %s1504_s12 }
  0x4b   : > { %p1507_p2 = pnand %p1506_p0, %p1505_p12  ;;  %p1513_p3 = scmp.lt.u32.totalorder %s1504_s12, %s1786_s8 }
  0x4c   : > { %p1512_p10 = por %p1511_p6, %p1510_p13 }
  0x4d   : > { %p1508_p1 = pneg %p1507_p2 }
  0x4e   : > { %p1514_p7 = por %p1513_p3, %p1512_p10 }
  0x50   : > { %p1515_p9 = pnand %p1514_p7, %p1508_p1 }
  0x52   : > { %1518 = shalt.err (!%p1515_p9)
}
  0x53   : > { %s1519_s30 = scalar_lea.vmem %s1788_s10, 128  ;;  %s1610_s15 = smov [#allocation2]  }
  0x54   : > { %p1520_p12 = scmp.ne.s32.totalorder %s1788_s10, %s1519_s30  ;;  %s1524_s16 = sshll.u32 %s1610_s15, 4  ;;  %s1525_s16 = int_to_ptr.vmem [resolvable:$false] %s1524_s16 }
  0x55   : > { %s1526_s9 = scalar_lea.vmem %s1525_s16, 256  ;;  %p1527_p4 = scmp.lt.s32.totalorder %s1788_s10, %s1525_s16 }
  0x56   : > { %p1522_p2 = pnand %p1520_p12, %p1506_p0  ;;  %p1528_p13 = scmp.lt.s32.totalorder %s1526_s9, %s1519_s30 }
  0x58   : > { %p1523_p5 = pneg %p1522_p2  ;;  %p1529_p6 = por %p1528_p13, %p1527_p4 }
  0x5a   : > { %p1530_p10 = pnand %p1529_p6, %p1523_p5 }
  0x5c   : > { %1533 = shalt.err (!%p1530_p10)
}
  0x5d   : > { %1374 = dma.hbm_to_vmem [thread:$0]  (!%p1790_p11), %s1786_s8, 128, %s1788_s10, %s209_s28  }
  0x5e   : > { %228 = sbr.rel (%p1693_p8) target bundleno = 1653 (0x675), region = 40  ;;  %s1822_s12 = sand.u32 (!%p1693_p8), 1, %s1596_s19  }
  0x5f   : > { %s1228_s13 = sshll.u32 (!%p1693_p8), %s1822_s12, 3  ;;  %s231_s29 = scalar_lea.sflag (!%p1693_p8), [#allocation3], %s1822_s12 }
  0x60   : > { %s234_s17 = scalar_lea.vmem (!%p1693_p8), [#allocation2], %s1228_s13  ;;  %p1978_p4 = scmp.ne.s32.totalorder (!%p1693_p8), %s1971_s24, 0 }
  0x65   : > { %1579 = dma.done.wait (%p1978_p4), %s231_s29, 128  }
  0x66   : > { %1581 = vsyncadd (%p1978_p4), %s231_s29, 4294967168  ;;  %p1979_p5 = scmp.eq.s32.totalorder %s1674_s22, 0 }
  0x68   : > { %1583 = dma.done.wait (%p1979_p5), [#allocation6], 1024   ;;  %p1980_p8 = pmov %p1979_p5 }
  0x69   : > { %v1611_v0 = vmov 0.0|0.0   ;;  %vm1612_vm0 = vmmov 0   ;;  %v1613_v1 = vmov 0.0   ;;  %v270_v2 = vld [vmem:[#allocation5] sm:$0xff]  ;;  %v271_v3 = vld [vmem:[#allocation5 + $0x8] sm:$0xff]  ;;  %v272_v4 = vld [vmem:[#allocation5 + $0x10] sm:$0xff] }
  0x6a   : > { %1585 = vsyncadd (%p1980_p8), [#allocation6], 4294966272  ;;  %1340 = vmatprep.subr.bf16.mxu0 %v1611_v0  ;;  %1286 = vmatprep.mubr.msk.f32.mxu0 %vm1612_vm0, %v1613_v1  ;;  %v1341_v5 = vpack.c.bf16 %v271_v3, %v270_v2  ;;  %v273_v6 = vld [vmem:[#allocation5 + $0x18] sm:$0xff]  ;;  %vm281_vm1 = vcmask 261120   ;;  %v1232_v9 = vld [vmem:[%s1964_s2] ss:$0 sm:$0xff] }
  0x6b   : > { %1289 = vmatprep.subr.mxu1 %v1613_v1  ;;  %1291 = vmatprep.mubr.msk.f32.mxu1 %vm1612_vm0, %v1613_v1  ;;  %v1344_v7 = vpack.c.bf16 %v273_v6, %v272_v4  ;;  %v269_v8 = vld [vmem:[%s234_s17] sm:$0xff]  ;;  %s1614_s8 = smov 104   ;;  %s1615_s10 = smov 120   ;;  %vm364_vm2 = vcmask 64512   ;;  %vm1028_vm3 = vcmask 130048   ;;  %vm1030_vm4 = vcmask 195584  }
  0x6c   : > { %1342 = vmatpush3.bf16.msra.mxu0 %v1341_v5  ;;  %s1616_s11 = smov 96   ;;  %s1617_s28 = smov 112  }
  0x6d   : > { %1343 = vmatprep.subr.bf16.mxu0 %v1611_v0  ;;  %s1618_s7 = smov 64   ;;  %s1619_s6 = smov 8  }
  0x6e   : > { %s1620_s30 = smov 16   ;;  %s1621_s15 = smov 24  }
  0x6f   : > { %s1249_s29 = sshll.u32 %s1674_s22, 7  ;;  %s268_s17 = scalar_lea.vmem [#allocation8], %s1228_s13 }
  0x70   : > { %1345 = vmatpush3.bf16.msra.mxu0 %v1344_v7  ;;  %s1131_s24 = sshll.u32 %s268_s17, 4  ;;  %p1981_p0 = scmp.ne.s32.totalorder %s1976_s23, 0  ;;  %s1919_s24 = int_to_ptr.vmem [resolvable:$true] %s1131_s24 }
  0x71   : > { %1309 = vmatprep.subr.mxu0 %v1613_v1  ;;  %s1534_s22 = scalar_lea.vmem %s1919_s24, 128  ;;  %s1622_s13 = smov [#allocation8]  }
  0x72   : > { %p1535_p11 = scmp.ne.s32.totalorder %s1919_s24, %s1534_s22 }
  0x73   : > { %1287 = vmatmul.mubr.msk.f32.vlgmr.msra.gmra.mrb[0].mxu0 %vm281_vm1, %v269_v8  ;;  %v1032_v8 = vld [vmem:[#allocation7] sm:$0xff] }
  0x74   : > { %1311 = vmatprep.mubr.msk.f32.mxu0 %vm1612_vm0, %v1613_v1  ;;  %p1536_p1 = pnand %p1535_p11, %p1981_p0 }
  0x76   : > { %p1537_p3 = pneg %p1536_p1 }
 0x146   : > { %v351_v10 = vpop.f32.mrb[0].mxu0 }
 0x147   : > { %v352_v11 = vadd.f32 %v1232_v9, %v351_v10  ;;  %v1288_v12 = vpop.f32.mrb[1].mxu0  ;;  %v1033_v9 = vld [vmem:[#allocation7 + $0x8] sm:$0xff] }
 0x148   : > { %v1347_v10 = vpack.c.bf16 %v1033_v9, %v1032_v8  ;;  %v1035_v12 = vld [vmem:[#allocation7 + $0x18] sm:$0xff] }
 0x149   : > { %360 = vrot.lane.b32.xlu1 %v352_v11, %s1614_s8  ;;  %356 = vrot.lane.b32.xlu0 %v352_v11, %s1615_s10  ;;  %s1917_s10 = scalar_lea.hbm %s1967_s5, %s1249_s29 }
 0x14d   : > { %362 = vrot.lane.b32.xlu1 %v352_v11, %s1616_s11  ;;  %358 = vrot.lane.b32.xlu0 %v352_v11, %s1617_s28  ;;  %s1538_s28 = sshll.u32 %s1622_s13, 4  ;;  %s1539_s28 = int_to_ptr.vmem [resolvable:$false] %s1538_s28 }
 0x14e   : > { %p1541_p7 = scmp.lt.s32.totalorder %s1919_s24, %s1539_s28 }
 0x1bb   : > { %v1850_v13 = vpop.permute.xlu1 %360  ;;  %v357_v14 = vpop.permute.xlu0 %356 }
 0x1bc   : > { %439 = vrot.lane.b32.xlu0 %v357_v14, %s1616_s11 }
 0x1bf   : > { %v363_v15 = vpop.permute.xlu1 %362  ;;  %v1852_v16 = vpop.permute.xlu0 %358 }
 0x1c0   : > { %1290 = vmatpush3.xpose.msk.msra.mxu1 %vm364_vm2, %v363_v15  ;;  %591 = vrot.lane.b32.xlu0 %v1850_v13, %s1616_s11 }
 0x1c1   : > { %515 = vrot.lane.b32.xlu1 %v1852_v16, %s1616_s11  ;;  %1294 = vmatprep.subr.mxu1 %v1613_v1  ;;  %s1118_s11 = scalar_lea.sflag [#allocation4], %s1822_s12 }
 0x1c3   : > { %1292 = vmatmul.mubr.msk.f32.vlgmr.msra.gmra.mrb[0].mxu1 %vm364_vm2, %v352_v11 }
 0x1c4   : > { %1296 = vmatprep.mubr.msk.f32.mxu1 %vm1612_vm0, %v1613_v1 }
 0x22e   : > { %v440_v17 = vpop.permute.xlu0 %439 }
 0x22f   : > { %1295 = vmatpush3.xpose.msk.msra.mxu1 %vm364_vm2, %v440_v17 }
 0x230   : > { %1299 = vmatprep.subr.mxu1 %v1613_v1 }
 0x232   : > { %1297 = vmatmul.mubr.msk.f32.vlgmr.msra.gmra.mrb[2].mxu1 %vm364_vm2, %v357_v14  ;;  %v592_v19 = vpop.permute.xlu0 %591 }
 0x233   : > { %v516_v18 = vpop.permute.xlu1 %515  ;;  %1301 = vmatprep.mubr.msk.f32.mxu1 %vm1612_vm0, %v1613_v1 }
 0x234   : > { %1300 = vmatpush3.xpose.msk.msra.mxu1 %vm364_vm2, %v516_v18 }
 0x235   : > { %1304 = vmatprep.subr.mxu1 %v1613_v1 }
 0x237   : > { %1302 = vmatmul.mubr.msk.f32.vlgmr.msra.gmra.mrb[4].mxu1 %vm364_vm2, %v1852_v16 }
 0x238   : > { %1305 = vmatpush3.xpose.msk.msra.mxu1 %vm364_vm2, %v592_v19  ;;  %1306 = vmatprep.mubr.msk.f32.mxu1 %vm1612_vm0, %v1613_v1 }
 0x239   : > { %1314 = vmatprep.subr.mxu1 %v1613_v1 }
 0x23b   : > { %1307 = vmatmul.mubr.msk.f32.vlgmr.msra.gmra.mrb[6].mxu1 %vm364_vm2, %v1850_v13 }
 0x23c   : > { %1316 = vmatprep.mubr.msk.f32.mxu1 %vm1612_vm0, %v1613_v1 }
 0x296   : > { %v435_v20 = vpop.f32.mrb[0].mxu1 }
 0x297   : > { %v1293_v21 = vpop.f32.mrb[1].mxu1  ;;  %v667_v22 = vsel %vm364_vm2, %v435_v20, -inf }
 0x298   : > { %668 = vmax.xlane.f32.xlu1 %v667_v22 }
 0x305   : > { %v511_v23 = vpop.f32.mrb[2].mxu1 }
 0x306   : > { %v1298_v24 = vpop.f32.mrb[3].mxu1  ;;  %v670_v25 = vsel %vm364_vm2, %v511_v23, -inf }
 0x307   : > { %671 = vmax.xlane.f32.xlu0 %v670_v25  ;;  %v1246_v24 = vld [vmem:[%s1966_s4] ss:$0 sm:$0xff] }
 0x30a   : > { %v587_v26 = vpop.f32.mrb[4].mxu1 }
 0x30b   : > { %v1303_v27 = vpop.f32.mrb[5].mxu1  ;;  %v673_v28 = vsel %vm364_vm2, %v587_v26, -inf }
 0x30c   : > { %674 = vmax.xlane.f32.xlu0 %v673_v28 }
 0x30e   : > { %v663_v29 = vpop.f32.mrb[6].mxu1 }
 0x30f   : > { %v1308_v30 = vpop.f32.mrb[7].mxu1  ;;  %v676_v31 = vsel %vm364_vm2, %v663_v29, -inf }
 0x310   : > { %677 = vmax.xlane.f32.xlu1 %v676_v31 }
 0x321   : > { %787 = vrot.lane.b32.xlu1 %v357_v14, %s1618_s7 }
 0x322   : > { %711 = vrot.lane.b32.xlu0 %v352_v11, %s1618_s7  ;;  %v1034_v11 = vld [vmem:[#allocation7 + $0x10] sm:$0xff] }
 0x325   : > { %v669_v32 = vpop.xlane.xlu1 %668 }
 0x326   : > { %v679_v33 = vsub.f32 %v435_v20, %v669_v32 }
 0x328   : > { %v683_v34 = vmul.f32 1.442695, %v679_v33 }
 0x32a   : > { %1432 = vpow2.f32 %v683_v34 }
 0x334   : > { %v1433_v35 = vpop.eup %1432 }
 0x335   : > { %v691_v36 = vsel %vm364_vm2, %v1433_v35, 0.0 }
 0x341   : > { %692 = vadd.xlane.f32.xlu0 %v691_v36 }
 0x394   : > { %v672_v37 = vpop.xlane.xlu0 %671 }
 0x395   : > { %v680_v38 = vsub.f32 %v511_v23, %v672_v37 }
 0x397   : > { %v685_v39 = vmul.f32 1.442695, %v680_v38 }
 0x399   : > { %1434 = vpow2.f32 %v685_v39  ;;  %v675_v40 = vpop.xlane.xlu0 %674 }
 0x39a   : > { %v681_v41 = vsub.f32 %v587_v26, %v675_v40 }
 0x39c   : > { %v687_v42 = vmul.f32 1.442695, %v681_v41 }
 0x39d   : > { %v678_v43 = vpop.xlane.xlu1 %677  ;;  %v712_v44 = vpop.permute.xlu0 %711 }
 0x39e   : > { %1436 = vpow2.f32 %v687_v42  ;;  %v682_v45 = vsub.f32 %v663_v29, %v678_v43  ;;  %1310 = vmatpush3.msra.mxu0 %v712_v44 }
 0x39f   : > { %1319 = vmatprep.subr.mxu0 %v1613_v1 }
 0x3a0   : > { %v689_v46 = vmul.f32 1.442695, %v682_v45 }
 0x3a1   : > { %v788_v47 = vpop.permute.xlu1 %787 }
 0x3a2   : > { %1438 = vpow2.f32 %v689_v46  ;;  %1315 = vmatpush3.msra.mxu1 %v788_v47 }
 0x3a3   : > { %v1435_v48 = vpop.eup %1434  ;;  %1324 = vmatprep.subr.mxu1 %v1613_v1 }
 0x3a4   : > { %v694_v49 = vsel %vm364_vm2, %v1435_v48, 0.0 }
 0x3a5   : > { %695 = vadd.xlane.f32.xlu1 %v694_v49 }
 0x3a8   : > { %v1437_v50 = vpop.eup %1436 }
 0x3a9   : > { %v697_v51 = vsel %vm364_vm2, %v1437_v50, 0.0 }
 0x3aa   : > { %698 = vadd.xlane.f32.xlu0 %v697_v51 }
 0x3ac   : > { %v1439_v52 = vpop.eup %1438 }
 0x3ad   : > { %v700_v53 = vsel %vm364_vm2, %v1439_v52, 0.0 }
 0x3ae   : > { %701 = vadd.xlane.f32.xlu1 %v700_v53 }
 0x3bf   : > { %863 = vrot.lane.b32.xlu1 %v1852_v16, %s1618_s7 }
 0x3c0   : > { %939 = vrot.lane.b32.xlu0 %v1850_v13, %s1618_s7  ;;  %v1350_v13 = vpack.c.bf16 %v1035_v12, %v1034_v11  ;;  %s1540_s7 = scalar_lea.vmem %s1539_s28, 256 }
 0x3c1   : > { %p1542_p9 = scmp.lt.s32.totalorder %s1540_s7, %s1534_s22 }
 0x3c3   : > { %p1543_p12 = por %p1542_p9, %p1541_p7 }
 0x3c5   : > { %p1544_p2 = pnand %p1543_p12, %p1537_p3 }
 0x3ce   : > { %v693_v54 = vpop.xlane.xlu0 %692 }
 0x3cf   : > { %1440 = vrcp.f32 %v693_v54 }
 0x3d9   : > { %v1441_v55 = vpop.eup %1440 }
 0x3da   : > { %v707_v56 = vmul.f32 %v1441_v55, %v1433_v35 }
 0x3dc   : > { %1312 = vmatmul.mubr.msk.f32.vlgmr.msra.gmra.mrb[2].mxu0 %vm364_vm2, %v707_v56 }
 0x3dd   : > { %1321 = vmatprep.mubr.msk.f32.mxu0 %vm1612_vm0, %v1613_v1 }
 0x432   : > { %v696_v57 = vpop.xlane.xlu1 %695 }
 0x433   : > { %1442 = vrcp.f32 %v696_v57 }
 0x437   : > { %v699_v58 = vpop.xlane.xlu0 %698 }
 0x438   : > { %1444 = vrcp.f32 %v699_v58 }
 0x43b   : > { %v702_v59 = vpop.xlane.xlu1 %701  ;;  %v940_v63 = vpop.permute.xlu0 %939 }
 0x43c   : > { %1446 = vrcp.f32 %v702_v59 }
 0x43d   : > { %v1443_v60 = vpop.eup %1442 }
 0x43e   : > { %v708_v61 = vmul.f32 %v1443_v60, %v1435_v48 }
 0x43f   : > { %v864_v62 = vpop.permute.xlu1 %863 }
 0x440   : > { %1320 = vmatpush3.msra.mxu0 %v864_v62  ;;  %1317 = vmatmul.mubr.msk.f32.vlgmr.msra.gmra.mrb[8].mxu1 %vm364_vm2, %v708_v61 }
 0x441   : > { %1325 = vmatpush3.msra.mxu1 %v940_v63  ;;  %1326 = vmatprep.mubr.msk.f32.mxu1 %vm1612_vm0, %v1613_v1 }
 0x442   : > { %v1445_v2 = vpop.eup %1444  ;;  %1346 = vmatprep.subr.bf16.mxu0 %v1611_v0 }
 0x443   : > { %v709_v3 = vmul.f32 %v1445_v2, %v1437_v50 }
 0x445   : > { %1322 = vmatmul.mubr.msk.f32.vlgmr.msra.gmra.mrb[4].mxu0 %vm364_vm2, %v709_v3 }
 0x446   : > { %v1447_v4 = vpop.eup %1446  ;;  %1337 = vmatprep.mubr.msk.f32.mxu0 %vm1612_vm0, %v1613_v1  ;;  %1348 = vmatpush3.bf16.msra.mxu0 %v1347_v10 }
 0x447   : > { %v710_v5 = vmul.f32 %v1447_v4, %v1439_v52  ;;  %1349 = vmatprep.subr.bf16.mxu0 %v1611_v0 }
 0x449   : > { %1327 = vmatmul.mubr.msk.f32.vlgmr.msra.gmra.mrb[10].mxu1 %vm364_vm2, %v710_v5 }
 0x44a   : > { %1351 = vmatpush3.bf16.msra.mxu0 %v1350_v13 }
 0x4af   : > { %v783_v6 = vpop.f32.mrb[2].mxu0 }
 0x4b0   : > { %v1313_v7 = vpop.f32.mrb[3].mxu0 }
 0x513   : > { %v859_v14 = vpop.f32.mrb[8].mxu1 }
 0x514   : > { %1016 = vrot.lane.b32.xlu1 %v859_v14, %s1619_s6  ;;  %v1318_v15 = vpop.f32.mrb[9].mxu1 }
 0x518   : > { %v935_v1 = vpop.f32.mrb[4].mxu0 }
 0x519   : > { %1020 = vrot.lane.b32.xlu0 %v935_v1, %s1620_s30  ;;  %v1323_v16 = vpop.f32.mrb[5].mxu0 }
 0x51c   : > { %v1011_v17 = vpop.f32.mrb[10].mxu1 }
 0x51d   : > { %1024 = vrot.lane.b32.xlu1 %v1011_v17, %s1621_s15  ;;  %v1328_v18 = vpop.f32.mrb[11].mxu1 }
 0x586   : > { %v1017_v19 = vpop.permute.xlu1 %1016 }
 0x587   : > { %v1027_v20 = vsel %vm364_vm2, %v783_v6, %v1017_v19 }
 0x58b   : > { %v1021_v0 = vpop.permute.xlu0 %1020 }
 0x58c   : > { %v1029_v21 = vsel %vm1028_vm3, %v1027_v20, %v1021_v0 }
 0x58f   : > { %v1025_v22 = vpop.permute.xlu1 %1024 }
 0x590   : > { %v1031_v23 = vsel %vm1030_vm4, %v1029_v21, %v1025_v22 }
 0x591   : > { %1338 = vmatmul.mubr.msk.f32.vlgmr.msra.gmra.mrb[6].mxu0 %vm281_vm1, %v1031_v23 }
 0x664   : > { %v1112_v25 = vpop.f32.mrb[6].mxu0 }
 0x665   : > { %v1113_v26 = vadd.f32 %v1246_v24, %v1112_v25  ;;  %v1339_v27 = vpop.f32.mrb[7].mxu0 }
 0x667   : > { %1116 = vst.msk [vmem:[%s268_s17] sm:$0xff] %vm281_vm1, %v1113_v26 }
 0x668   : > { %1547 = shalt.err (!%p1544_p2)
}
 0x669   : > { %s1548_s12 = scalar_lea.hbm %s1917_s10, 128  ;;  %s1552_s15 = scalar_lea.hbm %s1967_s5, 256 }
 0x66a   : > { %p1549_p13 = scmp.ne.s32.totalorder %s1917_s10, %s1548_s12  ;;  %p1553_p4 = scmp.lt.u32.totalorder %s1917_s10, %s1967_s5 }
 0x66b   : > { %p1554_p5 = scmp.lt.u32.totalorder %s1552_s15, %s1548_s12  ;;  %p1556_p11 = scmp.lt.u32.totalorder %s1548_s12, %s1917_s10 }
 0x66c   : > { %p1550_p6 = pnand %p1549_p13, %p1981_p0 }
 0x66d   : > { %p1555_p8 = por %p1554_p5, %p1553_p4 }
 0x66e   : > { %p1551_p10 = pneg %p1550_p6 }
 0x66f   : > { %p1557_p1 = por %p1556_p11, %p1555_p8 }
 0x671   : > { %p1558_p3 = pnand %p1557_p1, %p1551_p10 }
 0x673   : > { %1561 = shalt.err (!%p1558_p3)
}
 0x674   : > { %1362 = dma.vmem_to_hbm [thread:$0]  (%p1981_p0), %s1919_s24, 128, %s1917_s10, %s1118_s11  }
 0x675 PF: > { %s1143_s29 = sand.u32 1, %s1592_s18   ;;  %p1982_p7 = scmp.ne.s32.totalorder %s1972_s25, 0 }
 0x676   : > { %p1983_p9 = scmp.ge.s32.totalorder %s1604_s21, 2  ;;  %s1144_s17 = scalar_lea.sflag [#allocation4], %s1143_s29 }
 0x678   : > { %p1376_p12 = pnand %p1983_p9, %p1982_p7 }
 0x67a   : > { %1587 = dma.done.wait (!%p1376_p12), %s1144_s17, 128  }
 0x67b   : > { %1589 = vsyncadd (!%p1376_p12), %s1144_s17, 4294967168  ;;  %p19_p2 = scmp.ge.s32.totalorder %s1763_s14, 4   ;;  %s1984_s18 = smov %s1596_s19 }
 0x67c   : > { %s1985_s19 = smov %s1600_s20  ;;  %s1986_s20 = smov %s1779_s27 }
 0x67d   : > { %s1987_s21 = smov %s1763_s14  ;;  %21 = sbr.rel (!%p19_p2) target bundleno = 6 (0x6), region = 93 }
 0x684   :  { %1149 = vsyncpa [#allocation3], 1 }
 0x685   :  { %1151 = vsyncpa [#allocation3 + $0x1], 1 }
 0x686   :  { %1152 = vsyncpa [#allocation6], 1 }
 0x687   :  { %1153 = vsyncpa [#allocation4], 1 }
 0x688   :  { %1155 = vsyncpa [#allocation4 + $0x1], 1 }

</bundles_post_ra>
